<compile_context>
chip_gen: v5e
topology: v5e:2x2
jax: 0.10.0
libtpu: 0.0.40
codegen_flags: <defaults>
</compile_context>

<pallas_src>
import jax
import jax.numpy as jnp
import numpy as np
from jax.experimental import pallas as pl
from jax.experimental.pallas import tpu as pltpu


def _round_up(x, m):
    return ((x + m - 1) // m) * m


def _cdiv(a, b):
    return -(-a // b)


# Row layout of the (9, 8, P) joint buffer (first axis).
_ROW_JX, _ROW_JY, _ROW_JZ = 0, 1, 2
_ROW_TU, _ROW_TV = 3, 4
_ROW_W2 = 5
_ROW_TRX, _ROW_TRY, _ROW_TRZ = 6, 7, 8
_N_ROWS = 9

_N_SHARDS = 2          # leading "parallel" axis: uses both TCs on v7x, near no-op elsewhere
_LANE_TILE_MAX = 4096  # lanes per block -> 8*4096 = 32768 elements, ~1.1 MB of streamed rows


def smplify_loss_kernel(scalars_ref, joint_ref, out_ref):
    # --- scalar knobs (SMEM f32[18]: scale, rho, camera intrinsics/extrinsics) ---
    scale = scalars_ref[0]
    rho = scalars_ref[1]
    fx = scalars_ref[2]
    fy = scalars_ref[3]
    cx0 = scalars_ref[4]
    cy0 = scalars_ref[5]
    ctx = scalars_ref[6]
    cty = scalars_ref[7]
    ctz = scalars_ref[8]
    r00 = scalars_ref[9];  r01 = scalars_ref[10]; r02 = scalars_ref[11]
    r10 = scalars_ref[12]; r11 = scalars_ref[13]; r12 = scalars_ref[14]
    r20 = scalars_ref[15]; r21 = scalars_ref[16]; r22 = scalars_ref[17]

    # --- dense (8, lane_tile) slabs, one per quantity ---
    jx = joint_ref[_ROW_JX]
    jy = joint_ref[_ROW_JY]
    jz = joint_ref[_ROW_JZ]
    tu = joint_ref[_ROW_TU]
    tv = joint_ref[_ROW_TV]
    w2 = joint_ref[_ROW_W2]
    trx = joint_ref[_ROW_TRX]
    try_ = joint_ref[_ROW_TRY]
    trz = joint_ref[_ROW_TRZ]

    # model points: scale * joints + global translation (VPU FMAs; no MXU)
    px = scale * jx + trx
    py = scale * jy + try_
    pz = scale * jz + trz

    # perspective camera: R @ p + t   (9 scalar-broadcast FMAs)
    cam_x = r00 * px + r01 * py + r02 * pz + ctx
    cam_y = r10 * px + r11 * py + r12 * pz + cty
    cam_z = r20 * px + r21 * py + r22 * pz + ctz
    # NOTE: a real joint on the camera plane (cam_z == 0) yields inf/nan, same
    # as the PyTorch reference.  Padded lanes are constructed so cam_z == 1.

    # single approx reciprocal (EUP slot) shared by u and v
    inv_z = pl.reciprocal(cam_z, approx=True)
    u = fx * cam_x * inv_z + cx0
    v = fy * cam_y * inv_z + cy0

    # GMoF robustified residuals with one combined denominator (EUP reciprocal)
    du = tu - u
    dv = tv - v
    rho2 = rho * rho
    du2 = du * du
    dv2 = dv * dv
    a = du2 + rho2
    b = dv2 + rho2
    gmof = rho2 * (du2 * b + dv2 * a) * pl.reciprocal(a * b, approx=True)

    # accumulate into the resident per-shard VMEM output tile
    @pl.when(pl.program_id(1) == 0)
    def _():
        out_ref[...] = jnp.zeros_like(out_ref)

    out_ref[...] += w2 * gmof


def smplify_loss(joints, translation, target_joints, joints_conf,
                 joint_weights, betas, hand_pose,
                 *, scale, cam_rot, cam_t, focal, center,
                 data_weight, shape_weight, hand_prior_weight, rho):
    f32 = jnp.float32
    B, J, _ = joints.shape
    N = B * J

    cam_rot = jnp.asarray(cam_rot, f32).reshape(3, 3)
    cam_t = jnp.asarray(cam_t, f32).reshape(3)

    # --- consolidated SMEM scalar block ---
    scalars = jnp.concatenate([
        jnp.asarray([scale, rho, focal[0], focal[1], center[0], center[1]], f32),
        cam_t,
        cam_rot.reshape(9),
    ])  # (18,)

    # --- tiling: dense sublane x lane layout, split over shards/chunks ---
    lane_tile = min(_LANE_TILE_MAX, _round_up(_cdiv(N, 8 * _N_SHARDS), 128))
    cps = _cdiv(N, 8 * lane_tile * _N_SHARDS)          # chunks per shard
    P = lane_tile * _N_SHARDS * cps                    # lanes total (last axis)
    n_pad = 8 * P                                      # padded element count

    # --- build the 9 streamed rows (9, N) ---
    jr = joints.astype(f32).reshape(N, 3).T                        # (3, N)
    tg = target_joints.astype(f32).reshape(N, 2).T                 # (2, N)
    w2 = ((joints_conf * joint_weights).astype(f32) ** 2).reshape(1, N)
    tl = jnp.repeat(translation.astype(f32), J, axis=0).T          # (3, N)
    rows = jnp.concatenate([jr, tg, w2, tl], axis=0)               # (9, N)

    # Padded lanes contribute 0 (w2 == 0); pick a pad translation so cam_z == 1
    # there, keeping the approx reciprocal finite with no in-kernel mask.
    r2 = cam_rot[2]
    k = jnp.argmax(jnp.abs(r2))
    pad_t = jnp.zeros((3,), f32).at[k].set((1.0 - cam_t[2]) / r2[k])

    buf = jnp.zeros((_N_ROWS, n_pad), f32)
    buf = buf.at[:, :N].set(rows)
    buf = buf.at[_ROW_TRX:_ROW_TRZ + 1, N:].set(pad_t[:, None])
    buf = buf.reshape(_N_ROWS, 8, P)

    grid = (_N_SHARDS, cps)
    smem = pltpu.MemorySpace.SMEM

    partials = pl.pallas_call(
        smplify_loss_kernel,
        out_shape=jax.ShapeDtypeStruct((_N_SHARDS, 8, lane_tile), f32),
        grid=grid,
        in_specs=[
            pl.BlockSpec(memory_space=smem),                                   # scalars
            pl.BlockSpec((_N_ROWS, 8, lane_tile),
                         lambda s, j: (0, 0, s * cps + j)),                    # joint rows
        ],
        out_specs=pl.BlockSpec((None, 8, lane_tile), lambda s, j: (s, 0, 0)),  # per-shard acc
        compiler_params=pltpu.CompilerParams(
            dimension_semantics=("parallel", "arbitrary")),
    )(scalars, buf)

    # joint term scaling + priors (tiny XLA reductions; no kernel stream needed)
    joint_loss = jnp.sum(partials) * jnp.asarray(data_weight, f32) ** 2
    shape_loss = jnp.sum(betas.astype(f32) ** 2) * jnp.asarray(shape_weight, f32) ** 2
    hand_loss = jnp.sum(hand_pose.astype(f32) ** 2) * jnp.asarray(hand_prior_weight, f32) ** 2
    return joint_loss + shape_loss + hand_loss


def smplify_loss_ref(joints, translation, target_joints, joints_conf,
                     joint_weights, betas, hand_pose,
                     *, scale, cam_rot, cam_t, focal, center,
                     data_weight, shape_weight, hand_prior_weight, rho):
    pts = scale * joints + translation[:, None, :]
    cam = jnp.einsum('ij,bkj->bki', cam_rot, pts) + cam_t[None, None, :]
    img = jnp.stack([focal[0], focal[1]]) * cam[..., :2] / cam[..., 2:3] \
        + jnp.stack([center[0], center[1]])
    diff = target_joints - img
    sq = diff ** 2
    gmof = (rho ** 2) * sq / (sq + rho ** 2)
    w = (joint_weights * joints_conf)[..., None]
    joint_loss = jnp.sum(w ** 2 * gmof) * data_weight ** 2
    shape_loss = jnp.sum(betas ** 2) * shape_weight ** 2
    hand_loss = jnp.sum(hand_pose ** 2) * hand_prior_weight ** 2
    return joint_loss + shape_loss + hand_loss


if __name__ == "__main__":
    B, J, NB, NP = 2, 16, 10, 12
    key = jax.random.PRNGKey(0)
    ks = jax.random.split(key, 8)

    joints = 0.5 * jax.random.normal(ks[0], (B, J, 3), dtype=jnp.float32)
    translation = jnp.concatenate(
        [0.1 * jax.random.normal(ks[1], (B, 2), dtype=jnp.float32),
         jnp.full((B, 1), 0.5, dtype=jnp.float32)], axis=-1)
    target_joints = 50.0 * jax.random.normal(ks[2], (B, J, 2), dtype=jnp.float32)
    joints_conf = jax.random.uniform(ks[3], (B, J), dtype=jnp.float32)
    joint_weights = jnp.ones((B, J), dtype=jnp.float32)
    betas = jax.random.normal(ks[4], (B, NB), dtype=jnp.float32)
    hand_pose = jax.random.normal(ks[5], (B, NP), dtype=jnp.float32)

    # deterministic camera parameters (small rotation about z, z-offset 10)
    theta = 0.1
    cam_rot = jnp.array([[np.cos(theta), -np.sin(theta), 0.0],
                         [np.sin(theta),  np.cos(theta), 0.0],
                         [0.0,            0.0,           1.0]], dtype=jnp.float32)
    cam_t = jnp.array([0.05, -0.02, 10.0], dtype=jnp.float32)
    focal = (5000.0, 5000.0)
    center = (112.0, 112.0)

    params = dict(scale=1.2, cam_rot=cam_rot, cam_t=cam_t,
                  focal=focal, center=center,
                  data_weight=1.0, shape_weight=0.5,
                  hand_prior_weight=0.3, rho=100.0)

    out = smplify_loss(joints, translation, target_joints, joints_conf,
                       joint_weights, betas, hand_pose, **params)
    out = jax.block_until_ready(out)

    ref = smplify_loss_ref(joints, translation, target_joints, joints_conf,
                           joint_weights, betas, hand_pose, **params)
    # Tolerance relaxed vs. the exact-divide version: approx EUP reciprocals
    # (perf-review recommendation) carry ~1e-4 relative error amplified by fx.
    np.testing.assert_allclose(np.asarray(out), np.asarray(ref),
                               rtol=5e-3, atol=1.0)
    print("KERNEL_OK")
</pallas_src>

<mosaic_0001>
module attributes {stable_mosaic.version = 11 : i64} {
  func.func @smplify_loss_kernel(%arg0: i32, %arg1: i32, %arg2: memref<18xf32, #tpu.memory_space<smem>>, %arg3: memref<9x8x128xf32, #tpu.memory_space<vmem>>, %arg4: memref<1x8x128xf32, #tpu.memory_space<vmem>>) attributes {dimension_semantics = [#tpu.dimension_semantics<parallel>, #tpu.dimension_semantics<arbitrary>], iteration_bounds = array<i64: 2, 1>, scalar_prefetch = 0 : i64, scratch_operands = 0 : i64, tpu.core_type = #tpu.core_type<tc>, window_params = [{transform_indices = @transform_0, window_bounds = array<i64: 18>}, {transform_indices = @transform_1, window_bounds = array<i64: 9, 8, 128>}, {transform_indices = @transform_2, window_bounds = array<i64: 1, 8, 128>}]} {
    %c0 = arith.constant 0 : index
    %0 = memref.load %arg2[%c0] : memref<18xf32, #tpu.memory_space<smem>>
    %c1 = arith.constant 1 : index
    %1 = memref.load %arg2[%c1] : memref<18xf32, #tpu.memory_space<smem>>
    %c2 = arith.constant 2 : index
    %2 = memref.load %arg2[%c2] : memref<18xf32, #tpu.memory_space<smem>>
    %c3 = arith.constant 3 : index
    %3 = memref.load %arg2[%c3] : memref<18xf32, #tpu.memory_space<smem>>
    %c4 = arith.constant 4 : index
    %4 = memref.load %arg2[%c4] : memref<18xf32, #tpu.memory_space<smem>>
    %c5 = arith.constant 5 : index
    %5 = memref.load %arg2[%c5] : memref<18xf32, #tpu.memory_space<smem>>
    %c6 = arith.constant 6 : index
    %6 = memref.load %arg2[%c6] : memref<18xf32, #tpu.memory_space<smem>>
    %c7 = arith.constant 7 : index
    %7 = memref.load %arg2[%c7] : memref<18xf32, #tpu.memory_space<smem>>
    %c8 = arith.constant 8 : index
    %8 = memref.load %arg2[%c8] : memref<18xf32, #tpu.memory_space<smem>>
    %c9 = arith.constant 9 : index
    %9 = memref.load %arg2[%c9] : memref<18xf32, #tpu.memory_space<smem>>
    %c10 = arith.constant 10 : index
    %10 = memref.load %arg2[%c10] : memref<18xf32, #tpu.memory_space<smem>>
    %c11 = arith.constant 11 : index
    %11 = memref.load %arg2[%c11] : memref<18xf32, #tpu.memory_space<smem>>
    %c12 = arith.constant 12 : index
    %12 = memref.load %arg2[%c12] : memref<18xf32, #tpu.memory_space<smem>>
    %c13 = arith.constant 13 : index
    %13 = memref.load %arg2[%c13] : memref<18xf32, #tpu.memory_space<smem>>
    %c14 = arith.constant 14 : index
    %14 = memref.load %arg2[%c14] : memref<18xf32, #tpu.memory_space<smem>>
    %c15 = arith.constant 15 : index
    %15 = memref.load %arg2[%c15] : memref<18xf32, #tpu.memory_space<smem>>
    %c16 = arith.constant 16 : index
    %16 = memref.load %arg2[%c16] : memref<18xf32, #tpu.memory_space<smem>>
    %c17 = arith.constant 17 : index
    %17 = memref.load %arg2[%c17] : memref<18xf32, #tpu.memory_space<smem>>
    %c0_0 = arith.constant 0 : index
    %c0_1 = arith.constant 0 : index
    %c0_2 = arith.constant 0 : index
    %18 = vector.load %arg3[%c0_0, %c0_1, %c0_2] : memref<9x8x128xf32, #tpu.memory_space<vmem>>, vector<1x8x128xf32>
    %19 = vector.shape_cast %18 : vector<1x8x128xf32> to vector<8x128xf32>
    %c1_3 = arith.constant 1 : index
    %c0_4 = arith.constant 0 : index
    %c0_5 = arith.constant 0 : index
    %20 = vector.load %arg3[%c1_3, %c0_4, %c0_5] : memref<9x8x128xf32, #tpu.memory_space<vmem>>, vector<1x8x128xf32>
    %21 = vector.shape_cast %20 : vector<1x8x128xf32> to vector<8x128xf32>
    %c2_6 = arith.constant 2 : index
    %c0_7 = arith.constant 0 : index
    %c0_8 = arith.constant 0 : index
    %22 = vector.load %arg3[%c2_6, %c0_7, %c0_8] : memref<9x8x128xf32, #tpu.memory_space<vmem>>, vector<1x8x128xf32>
    %23 = vector.shape_cast %22 : vector<1x8x128xf32> to vector<8x128xf32>
    %c3_9 = arith.constant 3 : index
    %c0_10 = arith.constant 0 : index
    %c0_11 = arith.constant 0 : index
    %24 = vector.load %arg3[%c3_9, %c0_10, %c0_11] : memref<9x8x128xf32, #tpu.memory_space<vmem>>, vector<1x8x128xf32>
    %25 = vector.shape_cast %24 : vector<1x8x128xf32> to vector<8x128xf32>
    %c4_12 = arith.constant 4 : index
    %c0_13 = arith.constant 0 : index
    %c0_14 = arith.constant 0 : index
    %26 = vector.load %arg3[%c4_12, %c0_13, %c0_14] : memref<9x8x128xf32, #tpu.memory_space<vmem>>, vector<1x8x128xf32>
    %27 = vector.shape_cast %26 : vector<1x8x128xf32> to vector<8x128xf32>
    %c5_15 = arith.constant 5 : index
    %c0_16 = arith.constant 0 : index
    %c0_17 = arith.constant 0 : index
    %28 = vector.load %arg3[%c5_15, %c0_16, %c0_17] : memref<9x8x128xf32, #tpu.memory_space<vmem>>, vector<1x8x128xf32>
    %29 = vector.shape_cast %28 : vector<1x8x128xf32> to vector<8x128xf32>
    %c6_18 = arith.constant 6 : index
    %c0_19 = arith.constant 0 : index
    %c0_20 = arith.constant 0 : index
    %30 = vector.load %arg3[%c6_18, %c0_19, %c0_20] : memref<9x8x128xf32, #tpu.memory_space<vmem>>, vector<1x8x128xf32>
    %31 = vector.shape_cast %30 : vector<1x8x128xf32> to vector<8x128xf32>
    %c7_21 = arith.constant 7 : index
    %c0_22 = arith.constant 0 : index
    %c0_23 = arith.constant 0 : index
    %32 = vector.load %arg3[%c7_21, %c0_22, %c0_23] : memref<9x8x128xf32, #tpu.memory_space<vmem>>, vector<1x8x128xf32>
    %33 = vector.shape_cast %32 : vector<1x8x128xf32> to vector<8x128xf32>
    %c8_24 = arith.constant 8 : index
    %c0_25 = arith.constant 0 : index
    %c0_26 = arith.constant 0 : index
    %34 = vector.load %arg3[%c8_24, %c0_25, %c0_26] : memref<9x8x128xf32, #tpu.memory_space<vmem>>, vector<1x8x128xf32>
    %35 = vector.shape_cast %34 : vector<1x8x128xf32> to vector<8x128xf32>
    %36 = vector.broadcast %0 : f32 to vector<8x128xf32>
    %37 = arith.mulf %36, %19 : vector<8x128xf32>
    %38 = arith.addf %37, %31 : vector<8x128xf32>
    %39 = vector.broadcast %0 : f32 to vector<8x128xf32>
    %40 = arith.mulf %39, %21 : vector<8x128xf32>
    %41 = arith.addf %40, %33 : vector<8x128xf32>
    %42 = vector.broadcast %0 : f32 to vector<8x128xf32>
    %43 = arith.mulf %42, %23 : vector<8x128xf32>
    %44 = arith.addf %43, %35 : vector<8x128xf32>
    %45 = vector.broadcast %9 : f32 to vector<8x128xf32>
    %46 = arith.mulf %45, %38 : vector<8x128xf32>
    %47 = vector.broadcast %10 : f32 to vector<8x128xf32>
    %48 = arith.mulf %47, %41 : vector<8x128xf32>
    %49 = arith.addf %46, %48 : vector<8x128xf32>
    %50 = vector.broadcast %11 : f32 to vector<8x128xf32>
    %51 = arith.mulf %50, %44 : vector<8x128xf32>
    %52 = arith.addf %49, %51 : vector<8x128xf32>
    %53 = vector.broadcast %6 : f32 to vector<8x128xf32>
    %54 = arith.addf %52, %53 : vector<8x128xf32>
    %55 = vector.broadcast %12 : f32 to vector<8x128xf32>
    %56 = arith.mulf %55, %38 : vector<8x128xf32>
    %57 = vector.broadcast %13 : f32 to vector<8x128xf32>
    %58 = arith.mulf %57, %41 : vector<8x128xf32>
    %59 = arith.addf %56, %58 : vector<8x128xf32>
    %60 = vector.broadcast %14 : f32 to vector<8x128xf32>
    %61 = arith.mulf %60, %44 : vector<8x128xf32>
    %62 = arith.addf %59, %61 : vector<8x128xf32>
    %63 = vector.broadcast %7 : f32 to vector<8x128xf32>
    %64 = arith.addf %62, %63 : vector<8x128xf32>
    %65 = vector.broadcast %15 : f32 to vector<8x128xf32>
    %66 = arith.mulf %65, %38 : vector<8x128xf32>
    %67 = vector.broadcast %16 : f32 to vector<8x128xf32>
    %68 = arith.mulf %67, %41 : vector<8x128xf32>
    %69 = arith.addf %66, %68 : vector<8x128xf32>
    %70 = vector.broadcast %17 : f32 to vector<8x128xf32>
    %71 = arith.mulf %70, %44 : vector<8x128xf32>
    %72 = arith.addf %69, %71 : vector<8x128xf32>
    %73 = vector.broadcast %8 : f32 to vector<8x128xf32>
    %74 = arith.addf %72, %73 : vector<8x128xf32>
    %75 = tpu.reciprocal %74 {approx = true} : vector<8x128xf32> -> vector<8x128xf32>
    %76 = vector.broadcast %2 : f32 to vector<8x128xf32>
    %77 = arith.mulf %76, %54 : vector<8x128xf32>
    %78 = arith.mulf %77, %75 : vector<8x128xf32>
    %79 = vector.broadcast %4 : f32 to vector<8x128xf32>
    %80 = arith.addf %78, %79 : vector<8x128xf32>
    %81 = vector.broadcast %3 : f32 to vector<8x128xf32>
    %82 = arith.mulf %81, %64 : vector<8x128xf32>
    %83 = arith.mulf %82, %75 : vector<8x128xf32>
    %84 = vector.broadcast %5 : f32 to vector<8x128xf32>
    %85 = arith.addf %83, %84 : vector<8x128xf32>
    %86 = arith.subf %25, %80 : vector<8x128xf32>
    %87 = arith.subf %27, %85 : vector<8x128xf32>
    %88 = arith.mulf %1, %1 : f32
    %89 = arith.mulf %86, %86 : vector<8x128xf32>
    %90 = arith.mulf %87, %87 : vector<8x128xf32>
    %91 = vector.broadcast %88 : f32 to vector<8x128xf32>
    %92 = arith.addf %89, %91 : vector<8x128xf32>
    %93 = vector.broadcast %88 : f32 to vector<8x128xf32>
    %94 = arith.addf %90, %93 : vector<8x128xf32>
    %95 = arith.mulf %89, %94 : vector<8x128xf32>
    %96 = arith.mulf %90, %92 : vector<8x128xf32>
    %97 = arith.addf %95, %96 : vector<8x128xf32>
    %98 = vector.broadcast %88 : f32 to vector<8x128xf32>
    %99 = arith.mulf %98, %97 : vector<8x128xf32>
    %100 = arith.mulf %92, %94 : vector<8x128xf32>
    %101 = tpu.reciprocal %100 {approx = true} : vector<8x128xf32> -> vector<8x128xf32>
    %102 = arith.mulf %99, %101 : vector<8x128xf32>
    %c0_i32 = arith.constant 0 : i32
    %103 = arith.cmpi eq, %arg1, %c0_i32 : i32
    %104 = arith.extui %103 : i1 to i32
    %c0_i32_27 = arith.constant 0 : i32
    %105 = arith.cmpi ne, %104, %c0_i32_27 : i32
    scf.if %105 {
      %cst = arith.constant 0.000000e+00 : f32
      %113 = vector.broadcast %cst : f32 to vector<8x128xf32>
      %c0_34 = arith.constant 0 : index
      %c0_35 = arith.constant 0 : index
      %c0_36 = arith.constant 0 : index
      %114 = vector.load %arg4[%c0_34, %c0_35, %c0_36] : memref<1x8x128xf32, #tpu.memory_space<vmem>>, vector<1x8x128xf32>
      %115 = vector.shape_cast %114 : vector<1x8x128xf32> to vector<8x128xf32>
      %116 = vector.shape_cast %113 : vector<8x128xf32> to vector<1x8x128xf32>
      tpu.vector_store %arg4[%c0_34, %c0_35, %c0_36], %116 {strides = array<i32>} : memref<1x8x128xf32, #tpu.memory_space<vmem>>, vector<1x8x128xf32>,
    } else {
    }
    %c0_28 = arith.constant 0 : index
    %c0_29 = arith.constant 0 : index
    %c0_30 = arith.constant 0 : index
    %106 = vector.load %arg4[%c0_28, %c0_29, %c0_30] : memref<1x8x128xf32, #tpu.memory_space<vmem>>, vector<1x8x128xf32>
    %107 = vector.shape_cast %106 : vector<1x8x128xf32> to vector<8x128xf32>
    %108 = arith.mulf %29, %102 : vector<8x128xf32>
    %109 = arith.addf %107, %108 : vector<8x128xf32>
    %c0_31 = arith.constant 0 : index
    %c0_32 = arith.constant 0 : index
    %c0_33 = arith.constant 0 : index
    %110 = vector.load %arg4[%c0_31, %c0_32, %c0_33] : memref<1x8x128xf32, #tpu.memory_space<vmem>>, vector<1x8x128xf32>
    %111 = vector.shape_cast %110 : vector<1x8x128xf32> to vector<8x128xf32>
    %112 = vector.shape_cast %109 : vector<8x128xf32> to vector<1x8x128xf32>
    tpu.vector_store %arg4[%c0_31, %c0_32, %c0_33], %112 {strides = array<i32>} : memref<1x8x128xf32, #tpu.memory_space<vmem>>, vector<1x8x128xf32>,
    return
  }
  func.func @transform_0(%arg0: i32, %arg1: i32) -> i32 {
    %c0_i32 = arith.constant 0 : i32
    %c0_i32_0 = arith.constant 0 : i32
    return %c0_i32 : i32
  }
  func.func @transform_1(%arg0: i32, %arg1: i32) -> (i32, i32, i32) {
    %c1_i32 = arith.constant 1 : i32
    %0 = arith.muli %arg0, %c1_i32 : i32
    %1 = arith.addi %0, %arg1 : i32
    %c0_i32 = arith.constant 0 : i32
    %c0_i32_0 = arith.constant 0 : i32
    %c0_i32_1 = arith.constant 0 : i32
    return %c0_i32, %c0_i32_0, %1 : i32, i32, i32
  }
  func.func @transform_2(%arg0: i32, %arg1: i32) -> (i32, i32, i32) {
    %c0_i32 = arith.constant 0 : i32
    %c0_i32_0 = arith.constant 0 : i32
    %c0_i32_1 = arith.constant 0 : i32
    return %arg0, %c0_i32, %c0_i32_0 : i32, i32, i32
  }
}

</mosaic_0001>

<bundles_post_ra>
// kernel: tpu_custom_call.1
= control target key start
LH: loop header
LB: loop body
LE: loop exit
PB: predicated region body
PF: predicated region fallthrough
CT: control target
= control target key end

     0   :  { %s846_s0 = inlined_call_operand.hbm [shape: f32[18], index: 0, kind: input, shape index: {}]   ;;  %s847_s1 = inlined_call_operand.hbm [shape: f32[9,8,256], index: 1, kind: input, shape index: {}]   ;;  %s848_s2 = inlined_call_operand.hbm [shape: f32[2,8,128], index: 2, kind: output, shape index: {}]  }
   0x1   :  { %849 = sst [smem:[#allocation11_spill]] %s846_s0 }
   0x2   :  { %7 = vsyncpa [#allocation5], 0 }
   0x3   :  { %8 = vsyncpa [#allocation3], 0 }
   0x4   :  { %10 = vsyncpa [#allocation3 + $0x1], 0 }
   0x5   :  { %11 = vsyncpa [#allocation4], 0 }
   0x6   :  { %13 = vsyncpa [#allocation4 + $0x1], 0  ;;  %s680_s9 = smov 0   ;;  %s682_s10 = smov 0  }
   0x7   :  { %s684_s11 = smov 0   ;;  %s686_s12 = smov 0  }
   0x8   :  { %s688_s13 = smov 0   ;;  %s690_s14 = smov 0  }
   0x9 LB: > { %s407_s15 = sadd.s32 4294967295, %s659_s14   ;;  %s408_s16 = sadd.s32 4294967294, %s659_s14   ;;  %s659_s14 = sphi %s690_s14, %s19_s14   ;;  %s655_s13 = sphi %s688_s13, %s862_s13   ;;  %s651_s12 = sphi %s686_s12, %s861_s12   ;;  %s647_s11 = sphi %s684_s11, %s860_s11   ;;  %s643_s10 = sphi %s682_s10, %s859_s10   ;;  %s639_s9 = sphi %s680_s9, %s858_s9  }
   0xa   : > { %s61_s17 = sadd.s32 1, %s647_s11  ;;  %p68_p0 = scmp.ne.s32.totalorder %s647_s11, %s643_s10 }
   0xb   : > { %p69_p1 = scmp.eq.s32.totalorder %s659_s14, 0  ;;  %p74_p2 = scmp.ne.s32.totalorder %s643_s10, %s639_s9 }
   0xc   : > { %p718_p3 = scmp.eq.s32.totalorder %s407_s15, 0  ;;  %p98_p4 = scmp.eq.s32.totalorder %s407_s15, 1 }
   0xd   : > { %p722_p5 = por %p69_p1, %p68_p0  ;;  %p104_p6 = scmp.eq.s32.totalorder %s408_s16, 1 }
   0xe   : > { %p728_p7 = por %p718_p3, %p74_p2  ;;  %p732_p8 = por %p98_p4, %p68_p0 }
   0xf   : > { %p736_p9 = por %p104_p6, %p74_p2  ;;  %p409_p10 = scmp.ge.s32.totalorder %s659_s14, 1 }
  0x10   : > { %p111_p11 = scmp.lt.s32.totalorder %s659_s14, 3  ;;  %s855_s0 = sld [smem:[#allocation11_spill]] }
  0x11   : > { %p411_p13 = scmp.ge.s32.totalorder %s659_s14, 2  ;;  %p468_p0 = scmp.lt.s32.totalorder %s659_s14, 2 }
  0x12   : > { %p745_p12 = pnand %p409_p10, %p111_p11  ;;  %s31_s28 = sadd.s32 1, %s655_s13 }
  0x13   : > { %p755_p2 = pnand %p468_p0, %p722_p5  ;;  %p33_p6 = scmp.ge.s32.totalorder %s31_s28, 2 }
  0x14   : > { %p455_p1 = pneg %p745_p12  ;;  %s134_s29 = sand.u32 1, %s647_s11  }
  0x15   : > { %s661_s30 = smov [#allocation2]   ;;  %s864_s28 = smov (%p33_p6, %s31_s28), 0 }
  0x16   : > { %s123_s25 = sshll.u32 %s855_s0, 4  ;;  %p456_p4 = pnand %p455_p1, %p718_p3  ;;  %s124_s25 = int_to_ptr.hbm [resolvable:$true] %s123_s25 }
  0x17   : > { %s445_s3 = smul.u32 72, %s134_s29  ;;  %s58_s4 = ssub.s32 %s655_s13, %s864_s28 }
  0x18   : > { %458 = dma.hbm_to_smem (!%p456_p4), %s124_s25, 16, %s661_s30, [#allocation5]  }
  0x19   : > { %s412_s5 = sshll.u32 %s655_s13, 3  ;;  %p59_p10 = scmp.eq.s32.totalorder %s58_s4, 0 }
  0x1a   : > { %s143_s8 = scalar_lea.hbm %s847_s1, %s412_s5  ;;  %s138_s15 = scalar_lea.vmem [#allocation6], %s445_s3 }
  0x1b   : > { %s146_s16 = sshll.u32 %s138_s15, 4  ;;  %s144_s23 = sshll.u32 %s143_s8, 4  ;;  %s147_s16 = int_to_ptr.vmem [resolvable:$true] %s146_s16  ;;  %s145_s23 = int_to_ptr.hbm [resolvable:$true] %s144_s23 }
  0x1c   : > { %s774_s19 = scalar_select %p59_p10, %s647_s11, %s61_s17  }
  0x1d   : > { %s135_s24 = scalar_lea.sflag [#allocation3], %s134_s29  ;;  %s662_s25 = smov 256  }
  0x1e   : > { %s663_s30 = smov 128   ;;  %s664_s0 = smov 8  }
  0x1f   : > { %462 = dma.hbm_to_vmem [thread:$0]  (!%p755_p2), %s145_s23, 1152, %s147_s16, %s135_s24, %s662_s25, %s663_s30, %s664_s0  }
  0x20   : > { %158 = sbr.rel (%p745_p12) target bundleno = 102 (0x66), region = 28 }
  0x25   : > { %626 = dma.done.wait (%p718_p3), [#allocation5], 16  }
  0x26   : > { %628 = vsyncadd (%p718_p3), [#allocation5], 4294967280  ;;  %s785_s17 = sand.u32 1, %s643_s10  }
  0x27   : > { %s446_s29 = smul.u32 72, %s785_s17  ;;  %s166_s3 = scalar_lea.sflag [#allocation3], %s785_s17 }
  0x29   : > { %s789_s4 = scalar_lea.vmem [#allocation6], %s446_s29 }
  0x2a   : > { %630 = dma.done.wait (%p728_p7), %s166_s3, 1152  }
  0x2b   : > { %632 = vsyncadd (%p728_p7), %s166_s3, 4294966144 }
  0x2c   : > { %175 = sfence }
  0x2d   : > { %s193_s0 = sld [smem:[#allocation2]]  ;;  %v211_v0 = vld [vmem:[%s789_s4] sm:$0xff]  ;;  %v433_v1 = vld [vmem:[%s789_s4 + $0x8] sm:$0xff]  ;;  %v434_v5 = vld [vmem:[%s789_s4 + $0x10] sm:$0xff] }
  0x2e   : > { %s795_s18 = sld [smem:[#allocation2 + $0x6]]  ;;  %v438_v6 = vld [vmem:[%s789_s4 + $0x30] sm:$0xff]  ;;  %v439_v7 = vld [vmem:[%s789_s4 + $0x38] sm:$0xff]  ;;  %v440_v12 = vld [vmem:[%s789_s4 + $0x40] sm:$0xff] }
  0x2f   : > { %s424_s26 = sld [smem:[#allocation2 + $0x9]]  ;;  %v435_v52 = vld [vmem:[%s789_s4 + $0x18] sm:$0xff]  ;;  %v436_v53 = vld [vmem:[%s789_s4 + $0x20] sm:$0xff] }
  0x30   : > { %s425_s27 = sld [smem:[#allocation2 + $0xa]] }
  0x31   : > { %s426_s5 = sld [smem:[#allocation2 + $0xb]] }
  0x32   : > { %s427_s20 = sld [smem:[#allocation2 + $0xc]] }
  0x33   : > { %v228_v2 = vstv %s193_s0  ;;  %s428_s6 = sld [smem:[#allocation2 + $0xd]] }
  0x34   : > { %v229_v3 = vmul.f32 %v228_v2, %v211_v0  ;;  %v231_v4 = vmul.f32 %v433_v1, %v228_v2  ;;  %s429_s7 = sld [smem:[#allocation2 + $0xe]]  ;;  %v233_v10 = vmul.f32 %v434_v5, %v228_v2  ;;  %v243_v37 = vstv %s795_s18  ;;  %v437_v5 = vld [vmem:[%s789_s4 + $0x28] sm:$0xff]  ;;  %s593_s4 = scalar_lea.hbm %s848_s2, 16 }
  0x35   : > { %s430_s8 = sld [smem:[#allocation2 + $0xf]]  ;;  %v235_v11 = vstv %s424_s26  ;;  %s415_s26 = sshll.u32 %s785_s17, 3 }
  0x36   : > { %v230_v8 = vadd.f32 %v438_v6, %v229_v3  ;;  %v232_v9 = vadd.f32 %v439_v7, %v231_v4  ;;  %s431_s15 = sld [smem:[#allocation2 + $0x10]]  ;;  %v237_v13 = vstv %s425_s27  ;;  %v234_v18 = vadd.f32 %v440_v12, %v233_v10  ;;  %s442_s27 = sshll.u32 %s651_s12, 3 }
  0x37   : > { %s432_s16 = sld [smem:[#allocation2 + $0x11]]  ;;  %v240_v16 = vstv %s426_s5 }
  0x38   : > { %v236_v14 = vmul.f32 %v235_v11, %v230_v8  ;;  %v238_v15 = vmul.f32 %v237_v13, %v232_v9  ;;  %s423_s23 = sld [smem:[#allocation2 + $0x8]]  ;;  %v245_v17 = vstv %s427_s20  ;;  %v241_v24 = vmul.f32 %v240_v16, %v234_v18 }
  0x39   : > { %s422_s24 = sld [smem:[#allocation2 + $0x7]]  ;;  %v246_v19 = vmul.f32 %v245_v17, %v230_v8  ;;  %v247_v20 = vstv %s428_s6  ;;  %s311_s6 = scalar_lea.hbm %s848_s2, %s442_s27 }
  0x3a   : > { %v248_v21 = vmul.f32 %v247_v20, %v232_v9  ;;  %v250_v22 = vstv %s429_s7  ;;  %v239_v23 = vadd.f32 %v238_v15, %v236_v14  ;;  %s417_s25 = sld [smem:[#allocation2 + $0x2]]  ;;  %s191_s7 = scalar_lea.vmem [#allocation7], %s415_s26 }
  0x3b   : > { %v255_v25 = vstv %s430_s8  ;;  %v251_v27 = vmul.f32 %v250_v22, %v234_v18  ;;  %s418_s30 = sld [smem:[#allocation2 + $0x3]]  ;;  %s313_s8 = sshll.u32 %s191_s7, 4  ;;  %s314_s8 = int_to_ptr.vmem [resolvable:$true] %s313_s8 }
  0x3c   : > { %v249_v26 = vadd.f32 %v248_v21, %v246_v19  ;;  %v256_v28 = vmul.f32 %v255_v25, %v230_v8  ;;  %v257_v29 = vstv %s431_s15  ;;  %v242_v34 = vadd.f32 %v241_v24, %v239_v23  ;;  %s419_s29 = sld [smem:[#allocation2 + $0x4]]  ;;  %s315_s15 = sshll.u32 %s311_s6, 4  ;;  %s316_s15 = int_to_ptr.hbm [resolvable:$true] %s315_s15 }
  0x3d   : > { %v258_v30 = vmul.f32 %v257_v29, %v232_v9  ;;  %v260_v31 = vstv %s432_s16  ;;  %s420_s3 = sld [smem:[#allocation2 + $0x5]]  ;;  %s301_s16 = scalar_lea.sflag [#allocation4], %s785_s17 }
  0x3e   : > { %v261_v32 = vmul.f32 %v260_v31, %v234_v18  ;;  %v252_v35 = vadd.f32 %v251_v27, %v249_v26  ;;  %v263_v36 = vstv %s423_s23  ;;  %v244_v41 = vadd.f32 %v243_v37, %v242_v34  ;;  %s416_s0 = sld [smem:[#allocation2 + $0x1]]  ;;  %s587_s23 = sshra.s32 %s316_s15, 4  ;;  %s588_s23 = int_to_ptr.hbm [resolvable:$true] %s587_s23 }
  0x3f   : > { %v259_v33 = vadd.f32 %v258_v30, %v256_v28  ;;  %v253_v38 = vstv %s422_s24  ;;  %s589_s12 = scalar_lea.hbm %s588_s23, 8  ;;  %p594_p11 = scmp.lt.s32.totalorder %s588_s23, %s848_s2 }
  0x40   : > { %v254_v42 = vadd.f32 %v253_v38, %v252_v35  ;;  %v266_v43 = vstv %s417_s25  ;;  %p590_p3 = scmp.ne.s32.totalorder %s588_s23, %s589_s12  ;;  %p595_p12 = scmp.lt.s32.totalorder %s593_s4, %s589_s12 }
  0x41   : > { %v262_v39 = vadd.f32 %v261_v32, %v259_v33  ;;  %v271_v44 = vstv %s418_s30  ;;  %v267_v45 = vmul.f32 %v266_v43, %v244_v41 }
  0x42   : > { %v272_v46 = vmul.f32 %v271_v44, %v254_v42  ;;  %v269_v48 = vstv %s419_s29  ;;  %p591_p5 = pnand %p590_p3, %p732_p8  ;;  %p596_p0 = por %p595_p12, %p594_p11 }
  0x43   : > { %v264_v40 = vadd.f32 %v263_v36, %v262_v39  ;;  %v274_v49 = vstv %s420_s3 }
  0x44   : > { %s278_s18 = smul.f32 %s416_s0, %s416_s0  ;;  %p592_p7 = pneg %p591_p5 }
  0x45   : > { %524 = vrcp.f32 %v264_v40 }
  0x46   : > { %v281_v58 = vstv %s278_s18  ;;  %p597_p1 = pnand %p596_p0, %p592_p7 }
  0x4b   : > { %v525_v47 = vpop.eup %524 }
  0x4c   : > { %v268_v50 = vmul.f32 %v525_v47, %v267_v45  ;;  %v273_v51 = vmul.f32 %v525_v47, %v272_v46 }
  0x4e   : > { %v270_v54 = vadd.f32 %v269_v48, %v268_v50  ;;  %v275_v55 = vadd.f32 %v274_v49, %v273_v51 }
  0x50   : > { %v276_v56 = vsub.f32 %v435_v52, %v270_v54  ;;  %v277_v57 = vsub.f32 %v436_v53, %v275_v55 }
  0x52   : > { %v279_v59 = vmul.f32 %v276_v56, %v276_v56  ;;  %v280_v60 = vmul.f32 %v277_v57, %v277_v57 }
  0x54   : > { %v282_v61 = vadd.f32 %v281_v58, %v279_v59  ;;  %v283_v62 = vadd.f32 %v281_v58, %v280_v60 }
  0x56   : > { %v284_v63 = vmul.f32 %v283_v62, %v279_v59  ;;  %v285_v0 = vmul.f32 %v282_v61, %v280_v60  ;;  %v288_v1 = vmul.f32 %v283_v62, %v282_v61 }
  0x58   : > { %v286_v2 = vadd.f32 %v285_v0, %v284_v63  ;;  %526 = vrcp.f32 %v288_v1 }
  0x5a   : > { %v287_v3 = vmul.f32 %v286_v2, %v281_v58 }
  0x5e   : > { %v527_v4 = vpop.eup %526 }
  0x5f   : > { %v290_v6 = vmul.f32 %v527_v4, %v287_v3 }
  0x61   : > { %v297_v7 = vmul.f32 %v437_v5, %v290_v6 }
  0x63   : > { %299 = vst [vmem:[%s191_s7] sm:$0xff] %v297_v7 }
  0x64   : > { %600 = shalt.err (!%p597_p1)
}
  0x65   : > { %453 = dma.vmem_to_hbm [thread:$0]  (%p732_p8), %s314_s8, 128, %s316_s15, %s301_s16  }
  0x66 PF: > { %s327_s17 = sand.u32 1, %s639_s9   ;;  %p464_p2 = pnand %p411_p13, %p736_p9 }
  0x67   : > { %s328_s3 = scalar_lea.sflag [#allocation4], %s327_s17 }
  0x68   : > { %p465_p4 = pneg %p464_p2 }
  0x6a   : > { %634 = dma.done.wait (%p465_p4), %s328_s3, 128  }
  0x6b   : > { %636 = vsyncadd (%p465_p4), %s328_s3, 4294967168  ;;  %s19_s14 = sadd.s32 1, %s659_s14   ;;  %s858_s9 = smov %s643_s10 }
  0x6c   : > { %p16_p6 = scmp.ge.s32.totalorder %s19_s14, 4   ;;  %s859_s10 = smov %s647_s11 }
  0x6d   : > { %s860_s11 = smov %s774_s19  ;;  %s861_s12 = smov %s655_s13 }
  0x6e   : > { %s862_s13 = smov %s864_s28  ;;  %18 = sbr.rel (!%p16_p6) target bundleno = 9 (0x9), region = 90 }
  0x73   :  { %334 = vsyncpa [#allocation3], 1 }
  0x74   :  { %336 = vsyncpa [#allocation3 + $0x1], 1 }
  0x75   :  { %337 = vsyncpa [#allocation4], 1 }
  0x76   :  { %339 = vsyncpa [#allocation4 + $0x1], 1 }
  0x77   :  { %340 = vsyncpa [#allocation5], 1 }
  0x78   :  { %342 = vsyncpa [#allocation5 + $0x1], 1 }

</bundles_post_ra>
